<compile_context>
chip_gen: v7x
topology: tpu7x:2x2x1
jax: 0.10.0
libtpu: 0.0.40
codegen_flags: <defaults>
</compile_context>

<pallas_src>
import functools

import numpy as np
import jax
import jax.numpy as jnp
from jax.experimental import pallas as pl
from jax.experimental.pallas import tpu as pltpu

ELEM_LIST_LEN = 23
ATOM_FDIM = ELEM_LIST_LEN + 6 + 5 + 4 + 1   # 39
BOND_FDIM = 5 + 6                           # 11
MAX_NB = 6

HIDDEN = 32
DEPTH = 3


def _round_up(x, m):
    return (x + m - 1) // m * m


# ---------------------------------------------------------------------------
# Kernel A: bond -> bond message passing.
#   d == 0      : binput = fbonds @ W_i ; message_0 = relu(binput)
#   d >= 1      : message_d = relu(binput + (BG @ message_{d-1}) @ W_h)
# Scratch: binput (NB, H) f32, message double buffer (2*NB, H) f32.
# ---------------------------------------------------------------------------
def message_kernel(fbonds_ref, bg_ref, wi_ref, wh_ref, out_ref,
                   binput_scr, msg_scr):
    d = pl.program_id(0)            # depth step (carried, "arbitrary")
    i = pl.program_id(1)            # bond-row tile
    TM = out_ref.shape[0]
    NB = bg_ref.shape[1]
    row0 = pl.multiple_of(i * TM, TM)

    @pl.when(d == 0)
    def _init():
        binput = jnp.dot(fbonds_ref[...], wi_ref[...],
                         preferred_element_type=jnp.float32)
        msg0 = jnp.maximum(binput, 0.0)
        binput_scr[pl.ds(row0, TM), :] = binput
        msg_scr[pl.ds(row0, TM), :] = msg0                # slot 0
        out_ref[...] = msg0.astype(out_ref.dtype)

    @pl.when(d > 0)
    def _pass():
        read_slot = (d + 1) & 1      # == (d - 1) % 2
        write_slot = d & 1
        read_off = pl.multiple_of(read_slot * NB, TM)
        write_off = pl.multiple_of(write_slot * NB + row0, TM)

        old_msg = msg_scr[pl.ds(read_off, NB), :]          # (NB, H) f32
        nei = jnp.dot(bg_ref[...], old_msg.astype(jnp.bfloat16),
                      preferred_element_type=jnp.float32)  # (TM, H)
        nei = jnp.dot(nei.astype(jnp.bfloat16), wh_ref[...],
                      preferred_element_type=jnp.float32)
        new_msg = jnp.maximum(binput_scr[pl.ds(row0, TM), :] + nei, 0.0)

        msg_scr[pl.ds(write_off, TM), :] = new_msg
        out_ref[...] = new_msg.astype(out_ref.dtype)


# ---------------------------------------------------------------------------
# Kernel B: atom readout + per-molecule mean pooling.
#   ah   = relu(fatoms @ Wo_atom + (AG @ message) @ Wo_msg + b)
#   mol += scope_tile @ ah      (output block resident across atom tiles)
# ---------------------------------------------------------------------------
def readout_kernel(fatoms_ref, ag_ref, msg_ref, woa_ref, wom_ref, bo_ref,
                   scope_ref, out_ref):
    i = pl.program_id(0)

    nei_a = jnp.dot(ag_ref[...], msg_ref[...],
                    preferred_element_type=jnp.float32)          # (TA, H)
    ah = (jnp.dot(fatoms_ref[...], woa_ref[...],
                  preferred_element_type=jnp.float32)
          + jnp.dot(nei_a.astype(jnp.bfloat16), wom_ref[...],
                    preferred_element_type=jnp.float32)
          + bo_ref[...])
    ah = jnp.maximum(ah, 0.0)
    contrib = jnp.dot(scope_ref[...], ah,
                      preferred_element_type=jnp.float32)        # (B, H)

    @pl.when(i == 0)
    def _():
        out_ref[...] = contrib

    @pl.when(i > 0)
    def _():
        out_ref[...] += contrib


# ---------------------------------------------------------------------------
# jit-able glue + pallas_call wiring.
# ---------------------------------------------------------------------------
@functools.partial(jax.jit, static_argnames=("hidden_size", "depth"))
def _mpn_impl(W_i, W_h, W_o, b_o, fatoms, fbonds, agraph, bgraph,
              starts, lens, *, hidden_size, depth):
    f32, bf16 = jnp.float32, jnp.bfloat16
    num_atoms, afd = fatoms.shape
    num_bonds, bfd = fbonds.shape
    batch = starts.shape[0]

    TM = 256 if num_bonds > 128 else 128    # bond-row tile (256 feeds v6e/v7x MXU)
    TA = 256 if num_atoms > 128 else 128    # atom-row tile
    NB = _round_up(num_bonds, TM)           # lane / contraction dims -> x128+
    NA = _round_up(num_atoms, TA)
    BF = _round_up(bfd, 128)
    AF = _round_up(afd, 128)
    H = _round_up(hidden_size, 128)
    B = _round_up(batch, 8)

    # Padded bf16 features (0/1 valued -> exact in bf16).
    fbonds_p = jnp.zeros((NB, BF), bf16).at[:num_bonds, :bfd].set(fbonds.astype(bf16))
    fatoms_p = jnp.zeros((NA, AF), bf16).at[:num_atoms, :afd].set(fatoms.astype(bf16))

    # Gather-count matrices via scatter-add (no one_hot (N, MAX_NB, N) blowup).
    rows_b = jnp.repeat(jnp.arange(num_bonds, dtype=jnp.int32), MAX_NB)
    bg_p = (jnp.zeros((NB, NB), f32)
            .at[rows_b, bgraph.reshape(-1)].add(1.0)).astype(bf16)
    rows_a = jnp.repeat(jnp.arange(num_atoms, dtype=jnp.int32), MAX_NB)
    ag_p = (jnp.zeros((NA, NB), f32)
            .at[rows_a, agraph.reshape(-1)].add(1.0)).astype(bf16)

    # Per-molecule mean-pooling matrix (vectorized, guards len == 0).
    atom_idx = jnp.arange(NA, dtype=jnp.int32)
    in_mol = ((atom_idx[None, :] >= starts[:, None]) &
              (atom_idx[None, :] < (starts + lens)[:, None]))
    inv_len = 1.0 / jnp.maximum(lens, 1).astype(f32)
    scope_mat = in_mol.astype(f32) * inv_len[:, None]
    scope_p = jnp.zeros((B, NA), f32).at[:batch, :].set(scope_mat)

    # Weights (torch layout already transposed to (in, out)); bf16, zero-padded.
    wi_p = jnp.zeros((BF, H), bf16).at[:bfd, :hidden_size].set(W_i.astype(bf16))
    wh_p = jnp.zeros((H, H), bf16).at[:hidden_size, :hidden_size].set(W_h.astype(bf16))
    woa_p = jnp.zeros((AF, H), bf16).at[:afd, :hidden_size].set(W_o[:afd].astype(bf16))
    wom_p = jnp.zeros((H, H), bf16).at[:hidden_size, :hidden_size].set(
        W_o[afd:].astype(bf16))
    bo_p = jnp.zeros((1, H), f32).at[0, :hidden_size].set(b_o.astype(f32))

    n_bond_tiles = NB // TM
    n_atom_tiles = NA // TA

    # ----------------- Kernel A: message passing -------------------------
    flops_a = int(2 * NB * BF * H
                  + max(depth - 1, 0) * (2 * NB * NB * H + 2 * NB * H * H))
    bytes_a = int(2 * (NB * BF + max(depth - 1, 1) * NB * NB + BF * H + H * H
                       + depth * NB * H))
    vmem_a = int(2 * 2 * (TM * BF + TM * NB + BF * H + H * H + TM * H)
                 + 3 * NB * H * 4)
    vmem_limit_a = int(min(max(2 * vmem_a + (8 << 20), 32 << 20), 100 << 20))

    msg_final = pl.pallas_call(
        message_kernel,
        out_shape=jax.ShapeDtypeStruct((NB, H), bf16),
        grid_spec=pltpu.PrefetchScalarGridSpec(
            num_scalar_prefetch=0,
            grid=(depth, n_bond_tiles),
            in_specs=[
                # fbonds tile: only needed at d == 0 (avoid re-streaming later)
                pl.BlockSpec((TM, BF), lambda d, i: (jnp.where(d == 0, i, 0), 0)),
                # BG row tile: only needed at d >= 1
                pl.BlockSpec((TM, NB), lambda d, i: (jnp.where(d == 0, 0, i), 0)),
                pl.BlockSpec((BF, H), lambda d, i: (0, 0)),
                pl.BlockSpec((H, H), lambda d, i: (0, 0)),
            ],
            out_specs=pl.BlockSpec((TM, H), lambda d, i: (i, 0)),
            scratch_shapes=[pltpu.VMEM((NB, H), f32),       # binput
                            pltpu.VMEM((2 * NB, H), f32)],  # message double buffer
        ),
        compiler_params=pltpu.CompilerParams(
            dimension_semantics=("arbitrary", "arbitrary"),
            vmem_limit_bytes=vmem_limit_a),
        cost_estimate=pl.CostEstimate(flops=flops_a, transcendentals=0,
                                      bytes_accessed=bytes_a),
    )(fbonds_p, bg_p, wi_p, wh_p)

    # ----------------- Kernel B: atom readout + pooling ------------------
    flops_b = int(2 * NA * NB * H + 2 * NA * AF * H + 2 * NA * H * H
                  + 2 * B * NA * H)
    bytes_b = int(2 * (NA * AF + NA * NB + NB * H + AF * H + H * H)
                  + 4 * (B * NA + B * H))
    vmem_b = int(2 * 2 * (TA * AF + TA * NB + NB * H + AF * H + H * H + H)
                 + 2 * 4 * B * TA + 4 * B * H)
    vmem_limit_b = int(min(max(2 * vmem_b + (8 << 20), 32 << 20), 100 << 20))

    mol_p = pl.pallas_call(
        readout_kernel,
        out_shape=jax.ShapeDtypeStruct((B, H), f32),
        grid_spec=pltpu.PrefetchScalarGridSpec(
            num_scalar_prefetch=0,
            grid=(n_atom_tiles,),
            in_specs=[
                pl.BlockSpec((TA, AF), lambda i: (i, 0)),   # fatoms tile
                pl.BlockSpec((TA, NB), lambda i: (i, 0)),   # AG tile
                pl.BlockSpec((NB, H), lambda i: (0, 0)),    # final message (resident)
                pl.BlockSpec((AF, H), lambda i: (0, 0)),    # W_o (atom part)
                pl.BlockSpec((H, H), lambda i: (0, 0)),     # W_o (message part)
                pl.BlockSpec((1, H), lambda i: (0, 0)),     # bias
                pl.BlockSpec((B, TA), lambda i: (0, i)),    # scope pooling tile
            ],
            out_specs=pl.BlockSpec((B, H), lambda i: (0, 0)),
        ),
        compiler_params=pltpu.CompilerParams(
            dimension_semantics=("arbitrary",),
            vmem_limit_bytes=vmem_limit_b),
        cost_estimate=pl.CostEstimate(flops=flops_b, transcendentals=0,
                                      bytes_accessed=bytes_b),
    )(fatoms_p, ag_p, msg_final, woa_p, wom_p, bo_p, scope_p)

    return mol_p


def mpn_forward_pallas(params, fatoms, fbonds, agraph, bgraph, scope,
                       hidden_size=HIDDEN, depth=DEPTH):
    W_i, W_h, W_o, b_o = params  # (50,H), (H,H), (39+H,H), (H,)
    starts = jnp.asarray([s for s, _ in scope], dtype=jnp.int32)
    lens = jnp.asarray([l for _, l in scope], dtype=jnp.int32)
    mol_p = _mpn_impl(W_i, W_h, W_o, b_o, fatoms, fbonds,
                      agraph.astype(jnp.int32), bgraph.astype(jnp.int32),
                      starts, lens, hidden_size=hidden_size, depth=depth)
    return mol_p[:len(scope), :hidden_size]


# ---------------------------------------------------------------------------
# Pure-JAX reference (mirrors the PyTorch forward exactly).
# ---------------------------------------------------------------------------
def mpn_forward_ref(params, fatoms, fbonds, agraph, bgraph, scope,
                    hidden_size=HIDDEN, depth=DEPTH):
    W_i, W_h, W_o, b_o = params
    binput = fbonds @ W_i
    message = jax.nn.relu(binput)
    for _ in range(depth - 1):
        nei = jnp.take(message, bgraph, axis=0).sum(axis=1)
        nei = nei @ W_h
        message = jax.nn.relu(binput + nei)
    nei_a = jnp.take(message, agraph, axis=0).sum(axis=1)
    ainput = jnp.concatenate([fatoms, nei_a], axis=1)
    atom_hiddens = jax.nn.relu(ainput @ W_o + b_o)
    mol_vecs = []
    for st, le in scope:
        mol_vecs.append(atom_hiddens[st:st + le].mean(axis=0))
    return jnp.stack(mol_vecs, axis=0)


if __name__ == "__main__":
    key = jax.random.PRNGKey(0)
    k1, k2, k3, k4, k5, k6, k7, k8 = jax.random.split(key, 8)

    # Small synthetic molecular-graph batch (2 molecules: 5 + 4 atoms).
    num_atoms = 9
    num_bonds = 13           # includes the padding bond at index 0
    scope = [(0, 5), (5, 4)]

    fatoms = (jax.random.uniform(k1, (num_atoms, ATOM_FDIM)) < 0.3).astype(jnp.float32)
    fbonds = (jax.random.uniform(k2, (num_bonds, ATOM_FDIM + BOND_FDIM)) < 0.3
              ).astype(jnp.float32)
    fbonds = fbonds.at[0].set(0.0)   # padding bond row, as in tensorize()
    agraph = jax.random.randint(k3, (num_atoms, MAX_NB), 0, num_bonds, dtype=jnp.int32)
    bgraph = jax.random.randint(k4, (num_bonds, MAX_NB), 0, num_bonds, dtype=jnp.int32)

    # Deterministic parameters (torch layout transposed to (in, out)).
    W_i = 0.1 * jax.random.normal(k5, (ATOM_FDIM + BOND_FDIM, HIDDEN), jnp.float32)
    W_h = 0.1 * jax.random.normal(k6, (HIDDEN, HIDDEN), jnp.float32)
    W_o = 0.1 * jax.random.normal(k7, (ATOM_FDIM + HIDDEN, HIDDEN), jnp.float32)
    b_o = 0.1 * jax.random.normal(k8, (HIDDEN,), jnp.float32)
    params = (W_i, W_h, W_o, b_o)

    out = mpn_forward_pallas(params, fatoms, fbonds, agraph, bgraph, scope)
    out = jax.block_until_ready(out)

    ref = jax.block_until_ready(
        mpn_forward_ref(params, fatoms, fbonds, agraph, bgraph, scope))

    assert out.shape == (2, HIDDEN), out.shape
    # bf16 matmul inputs (f32 accumulation) -> compare at bf16-level tolerance.
    np.testing.assert_allclose(np.asarray(out), np.asarray(ref),
                               rtol=3e-2, atol=3e-2)
    print("KERNEL_OK")
</pallas_src>

<mosaic_0001>
module attributes {stable_mosaic.version = 11 : i64} {
  func.func @message_kernel(%arg0: i32, %arg1: i32, %arg2: memref<128x128xbf16, #tpu.memory_space<vmem>>, %arg3: memref<128x128xbf16, #tpu.memory_space<vmem>>, %arg4: memref<128x128xbf16, #tpu.memory_space<vmem>>, %arg5: memref<128x128xbf16, #tpu.memory_space<vmem>>, %arg6: memref<128x128xbf16, #tpu.memory_space<vmem>>, %arg7: memref<128x128xf32, #tpu.memory_space<vmem>>, %arg8: memref<256x128xf32, #tpu.memory_space<vmem>>) attributes {dimension_semantics = [#tpu.dimension_semantics<arbitrary>, #tpu.dimension_semantics<arbitrary>], iteration_bounds = array<i64: 3, 1>, scalar_prefetch = 0 : i64, scratch_operands = 2 : i64, tpu.core_type = #tpu.core_type<tc>, window_params = [{transform_indices = @transform_0, window_bounds = array<i64: 128, 128>}, {transform_indices = @transform_1, window_bounds = array<i64: 128, 128>}, {pipeline_mode = #tpu.pipeline_mode<synchronous>, transform_indices = @transform_2, window_bounds = array<i64: 128, 128>}, {pipeline_mode = #tpu.pipeline_mode<synchronous>, transform_indices = @transform_3, window_bounds = array<i64: 128, 128>}, {transform_indices = @transform_4, window_bounds = array<i64: 128, 128>}]} {
    %c128_i32 = arith.constant 128 : i32
    %0 = arith.muli %arg1, %c128_i32 : i32
    %1 = tpu.assume_multiple %0, 128 : i32
    %c0_i32 = arith.constant 0 : i32
    %2 = arith.cmpi eq, %arg0, %c0_i32 : i32
    %3 = arith.extui %2 : i1 to i32
    %c0_i32_0 = arith.constant 0 : i32
    %4 = arith.cmpi ne, %3, %c0_i32_0 : i32
    scf.if %4 {
      %c0 = arith.constant 0 : index
      %c0_3 = arith.constant 0 : index
      %8 = vector.load %arg2[%c0, %c0_3] : memref<128x128xbf16, #tpu.memory_space<vmem>>, vector<128x128xbf16>
      %c0_4 = arith.constant 0 : index
      %c0_5 = arith.constant 0 : index
      %9 = vector.load %arg4[%c0_4, %c0_5] : memref<128x128xbf16, #tpu.memory_space<vmem>>, vector<128x128xbf16>
      %cst = arith.constant dense<0.000000e+00> : vector<128x128xf32>
      %10 = tpu.matmul %8, %9, %cst {dimension_numbers = #tpu.dot_dimension_numbers<[1], [0], [0], [1], [0, 0, 1, 1], [], []>} : vector<128x128xbf16>, vector<128x128xbf16>, vector<128x128xf32> -> vector<128x128xf32>
      %cst_6 = arith.constant 0.000000e+00 : f32
      %11 = vector.broadcast %cst_6 : f32 to vector<128x128xf32>
      %12 = arith.maximumf %10, %11 : vector<128x128xf32>
      %13 = arith.index_cast %1 : i32 to index
      %c0_7 = arith.constant 0 : index
      %14 = vector.load %arg7[%13, %c0_7] : memref<128x128xf32, #tpu.memory_space<vmem>>, vector<128x128xf32>
      tpu.vector_store %arg7[%13, %c0_7], %10 {strides = array<i32>} : memref<128x128xf32, #tpu.memory_space<vmem>>, vector<128x128xf32>,
      %15 = arith.index_cast %1 : i32 to index
      %c0_8 = arith.constant 0 : index
      %16 = vector.load %arg8[%15, %c0_8] : memref<256x128xf32, #tpu.memory_space<vmem>>, vector<128x128xf32>
      tpu.vector_store %arg8[%15, %c0_8], %12 {strides = array<i32>} : memref<256x128xf32, #tpu.memory_space<vmem>>, vector<128x128xf32>,
      %17 = arith.truncf %12 : vector<128x128xf32> to vector<128x128xbf16>
      %c0_9 = arith.constant 0 : index
      %c0_10 = arith.constant 0 : index
      %18 = vector.load %arg6[%c0_9, %c0_10] : memref<128x128xbf16, #tpu.memory_space<vmem>>, vector<128x128xbf16>
      tpu.vector_store %arg6[%c0_9, %c0_10], %17 {strides = array<i32>} : memref<128x128xbf16, #tpu.memory_space<vmem>>, vector<128x128xbf16>,
    } else {
    }
    %c0_i32_1 = arith.constant 0 : i32
    %5 = arith.cmpi sgt, %arg0, %c0_i32_1 : i32
    %6 = arith.extui %5 : i1 to i32
    %c0_i32_2 = arith.constant 0 : i32
    %7 = arith.cmpi ne, %6, %c0_i32_2 : i32
    scf.if %7 {
      %c1_i32 = arith.constant 1 : i32
      %8 = arith.addi %arg0, %c1_i32 : i32
      %c1_i32_3 = arith.constant 1 : i32
      %9 = arith.andi %8, %c1_i32_3 : i32
      %c1_i32_4 = arith.constant 1 : i32
      %10 = arith.andi %arg0, %c1_i32_4 : i32
      %c128_i32_5 = arith.constant 128 : i32
      %11 = arith.muli %9, %c128_i32_5 : i32
      %12 = tpu.assume_multiple %11, 128 : i32
      %c128_i32_6 = arith.constant 128 : i32
      %13 = arith.muli %10, %c128_i32_6 : i32
      %14 = arith.addi %13, %1 : i32
      %15 = tpu.assume_multiple %14, 128 : i32
      %16 = arith.index_cast %12 : i32 to index
      %c0 = arith.constant 0 : index
      %17 = vector.load %arg8[%16, %c0] : memref<256x128xf32, #tpu.memory_space<vmem>>, vector<128x128xf32>
      %c0_7 = arith.constant 0 : index
      %c0_8 = arith.constant 0 : index
      %18 = vector.load %arg3[%c0_7, %c0_8] : memref<128x128xbf16, #tpu.memory_space<vmem>>, vector<128x128xbf16>
      %19 = arith.truncf %17 : vector<128x128xf32> to vector<128x128xbf16>
      %cst = arith.constant dense<0.000000e+00> : vector<128x128xf32>
      %20 = tpu.matmul %18, %19, %cst {dimension_numbers = #tpu.dot_dimension_numbers<[1], [0], [0], [1], [0, 0, 1, 1], [], []>} : vector<128x128xbf16>, vector<128x128xbf16>, vector<128x128xf32> -> vector<128x128xf32>
      %21 = arith.truncf %20 : vector<128x128xf32> to vector<128x128xbf16>
      %c0_9 = arith.constant 0 : index
      %c0_10 = arith.constant 0 : index
      %22 = vector.load %arg5[%c0_9, %c0_10] : memref<128x128xbf16, #tpu.memory_space<vmem>>, vector<128x128xbf16>
      %cst_11 = arith.constant dense<0.000000e+00> : vector<128x128xf32>
      %23 = tpu.matmul %21, %22, %cst_11 {dimension_numbers = #tpu.dot_dimension_numbers<[1], [0], [0], [1], [0, 0, 1, 1], [], []>} : vector<128x128xbf16>, vector<128x128xbf16>, vector<128x128xf32> -> vector<128x128xf32>
      %24 = arith.index_cast %1 : i32 to index
      %c0_12 = arith.constant 0 : index
      %25 = vector.load %arg7[%24, %c0_12] : memref<128x128xf32, #tpu.memory_space<vmem>>, vector<128x128xf32>
      %26 = arith.addf %25, %23 : vector<128x128xf32>
      %cst_13 = arith.constant 0.000000e+00 : f32
      %27 = vector.broadcast %cst_13 : f32 to vector<128x128xf32>
      %28 = arith.maximumf %26, %27 : vector<128x128xf32>
      %29 = arith.index_cast %15 : i32 to index
      %c0_14 = arith.constant 0 : index
      %30 = vector.load %arg8[%29, %c0_14] : memref<256x128xf32, #tpu.memory_space<vmem>>, vector<128x128xf32>
      tpu.vector_store %arg8[%29, %c0_14], %28 {strides = array<i32>} : memref<256x128xf32, #tpu.memory_space<vmem>>, vector<128x128xf32>,
      %31 = arith.truncf %28 : vector<128x128xf32> to vector<128x128xbf16>
      %c0_15 = arith.constant 0 : index
      %c0_16 = arith.constant 0 : index
      %32 = vector.load %arg6[%c0_15, %c0_16] : memref<128x128xbf16, #tpu.memory_space<vmem>>, vector<128x128xbf16>
      tpu.vector_store %arg6[%c0_15, %c0_16], %31 {strides = array<i32>} : memref<128x128xbf16, #tpu.memory_space<vmem>>, vector<128x128xbf16>,
    } else {
    }
    return
  }
  func.func @transform_0(%arg0: i32, %arg1: i32) -> (i32, i32) {
    %c0_i32 = arith.constant 0 : i32
    %0 = arith.cmpi eq, %arg0, %c0_i32 : i32
    %c0_i32_0 = arith.constant 0 : i32
    %1 = arith.select %0, %arg1, %c0_i32_0 : i32
    %c0_i32_1 = arith.constant 0 : i32
    %c0_i32_2 = arith.constant 0 : i32
    return %1, %c0_i32_1 : i32, i32
  }
  func.func @transform_1(%arg0: i32, %arg1: i32) -> (i32, i32) {
    %c0_i32 = arith.constant 0 : i32
    %0 = arith.cmpi eq, %arg0, %c0_i32 : i32
    %c0_i32_0 = arith.constant 0 : i32
    %1 = arith.select %0, %c0_i32_0, %arg1 : i32
    %c0_i32_1 = arith.constant 0 : i32
    %c0_i32_2 = arith.constant 0 : i32
    return %1, %c0_i32_1 : i32, i32
  }
  func.func @transform_2(%arg0: i32, %arg1: i32) -> (i32, i32) {
    %c0_i32 = arith.constant 0 : i32
    %c0_i32_0 = arith.constant 0 : i32
    %c0_i32_1 = arith.constant 0 : i32
    return %c0_i32, %c0_i32_0 : i32, i32
  }
  func.func @transform_3(%arg0: i32, %arg1: i32) -> (i32, i32) {
    %c0_i32 = arith.constant 0 : i32
    %c0_i32_0 = arith.constant 0 : i32
    %c0_i32_1 = arith.constant 0 : i32
    return %c0_i32, %c0_i32_0 : i32, i32
  }
  func.func @transform_4(%arg0: i32, %arg1: i32) -> (i32, i32) {
    %c0_i32 = arith.constant 0 : i32
    %c0_i32_0 = arith.constant 0 : i32
    return %arg1, %c0_i32 : i32, i32
  }
}

module attributes {stable_mosaic.version = 11 : i64} {
  func.func @readout_kernel(%arg0: i32, %arg1: memref<128x128xbf16, #tpu.memory_space<vmem>>, %arg2: memref<128x128xbf16, #tpu.memory_space<vmem>>, %arg3: memref<128x128xbf16, #tpu.memory_space<vmem>>, %arg4: memref<128x128xbf16, #tpu.memory_space<vmem>>, %arg5: memref<128x128xbf16, #tpu.memory_space<vmem>>, %arg6: memref<1x128xf32, #tpu.memory_space<vmem>>, %arg7: memref<8x128xf32, #tpu.memory_space<vmem>>, %arg8: memref<8x128xf32, #tpu.memory_space<vmem>>) attributes {dimension_semantics = [#tpu.dimension_semantics<arbitrary>], iteration_bounds = array<i64: 1>, scalar_prefetch = 0 : i64, scratch_operands = 0 : i64, tpu.core_type = #tpu.core_type<tc>, window_params = [{transform_indices = @transform_0, window_bounds = array<i64: 128, 128>}, {transform_indices = @transform_1, window_bounds = array<i64: 128, 128>}, {pipeline_mode = #tpu.pipeline_mode<synchronous>, transform_indices = @transform_2, window_bounds = array<i64: 128, 128>}, {pipeline_mode = #tpu.pipeline_mode<synchronous>, transform_indices = @transform_3, window_bounds = array<i64: 128, 128>}, {pipeline_mode = #tpu.pipeline_mode<synchronous>, transform_indices = @transform_4, window_bounds = array<i64: 128, 128>}, {pipeline_mode = #tpu.pipeline_mode<synchronous>, transform_indices = @transform_5, window_bounds = array<i64: 1, 128>}, {transform_indices = @transform_6, window_bounds = array<i64: 8, 128>}, {pipeline_mode = #tpu.pipeline_mode<synchronous>, transform_indices = @transform_7, window_bounds = array<i64: 8, 128>}]} {
    %c0 = arith.constant 0 : index
    %c0_0 = arith.constant 0 : index
    %0 = vector.load %arg2[%c0, %c0_0] : memref<128x128xbf16, #tpu.memory_space<vmem>>, vector<128x128xbf16>
    %c0_1 = arith.constant 0 : index
    %c0_2 = arith.constant 0 : index
    %1 = vector.load %arg3[%c0_1, %c0_2] : memref<128x128xbf16, #tpu.memory_space<vmem>>, vector<128x128xbf16>
    %cst = arith.constant dense<0.000000e+00> : vector<128x128xf32>
    %2 = tpu.matmul %0, %1, %cst {dimension_numbers = #tpu.dot_dimension_numbers<[1], [0], [0], [1], [0, 0, 1, 1], [], []>} : vector<128x128xbf16>, vector<128x128xbf16>, vector<128x128xf32> -> vector<128x128xf32>
    %c0_3 = arith.constant 0 : index
    %c0_4 = arith.constant 0 : index
    %3 = vector.load %arg1[%c0_3, %c0_4] : memref<128x128xbf16, #tpu.memory_space<vmem>>, vector<128x128xbf16>
    %c0_5 = arith.constant 0 : index
    %c0_6 = arith.constant 0 : index
    %4 = vector.load %arg4[%c0_5, %c0_6] : memref<128x128xbf16, #tpu.memory_space<vmem>>, vector<128x128xbf16>
    %cst_7 = arith.constant dense<0.000000e+00> : vector<128x128xf32>
    %5 = tpu.matmul %3, %4, %cst_7 {dimension_numbers = #tpu.dot_dimension_numbers<[1], [0], [0], [1], [0, 0, 1, 1], [], []>} : vector<128x128xbf16>, vector<128x128xbf16>, vector<128x128xf32> -> vector<128x128xf32>
    %6 = arith.truncf %2 : vector<128x128xf32> to vector<128x128xbf16>
    %c0_8 = arith.constant 0 : index
    %c0_9 = arith.constant 0 : index
    %7 = vector.load %arg5[%c0_8, %c0_9] : memref<128x128xbf16, #tpu.memory_space<vmem>>, vector<128x128xbf16>
    %cst_10 = arith.constant dense<0.000000e+00> : vector<128x128xf32>
    %8 = tpu.matmul %6, %7, %cst_10 {dimension_numbers = #tpu.dot_dimension_numbers<[1], [0], [0], [1], [0, 0, 1, 1], [], []>} : vector<128x128xbf16>, vector<128x128xbf16>, vector<128x128xf32> -> vector<128x128xf32>
    %9 = arith.addf %5, %8 : vector<128x128xf32>
    %c0_11 = arith.constant 0 : index
    %c0_12 = arith.constant 0 : index
    %10 = vector.load %arg6[%c0_11, %c0_12] : memref<1x128xf32, #tpu.memory_space<vmem>>, vector<1x128xf32>
    %11 = vector.broadcast %10 : vector<1x128xf32> to vector<128x128xf32>
    %12 = arith.addf %9, %11 : vector<128x128xf32>
    %cst_13 = arith.constant 0.000000e+00 : f32
    %13 = vector.broadcast %cst_13 : f32 to vector<128x128xf32>
    %14 = arith.maximumf %12, %13 : vector<128x128xf32>
    %c0_14 = arith.constant 0 : index
    %c0_15 = arith.constant 0 : index
    %15 = vector.load %arg7[%c0_14, %c0_15] : memref<8x128xf32, #tpu.memory_space<vmem>>, vector<8x128xf32>
    %cst_16 = arith.constant dense<0.000000e+00> : vector<8x128xf32>
    %16 = tpu.matmul %15, %14, %cst_16 {dimension_numbers = #tpu.dot_dimension_numbers<[1], [0], [0], [1], [0, 0, 1, 1], [], []>} : vector<8x128xf32>, vector<128x128xf32>, vector<8x128xf32> -> vector<8x128xf32>
    %c0_i32 = arith.constant 0 : i32
    %17 = arith.cmpi eq, %arg0, %c0_i32 : i32
    %18 = arith.extui %17 : i1 to i32
    %c0_i32_17 = arith.constant 0 : i32
    %19 = arith.cmpi ne, %18, %c0_i32_17 : i32
    scf.if %19 {
      %c0_20 = arith.constant 0 : index
      %c0_21 = arith.constant 0 : index
      %23 = vector.load %arg8[%c0_20, %c0_21] : memref<8x128xf32, #tpu.memory_space<vmem>>, vector<8x128xf32>
      tpu.vector_store %arg8[%c0_20, %c0_21], %16 {strides = array<i32>} : memref<8x128xf32, #tpu.memory_space<vmem>>, vector<8x128xf32>,
    } else {
    }
    %c0_i32_18 = arith.constant 0 : i32
    %20 = arith.cmpi sgt, %arg0, %c0_i32_18 : i32
    %21 = arith.extui %20 : i1 to i32
    %c0_i32_19 = arith.constant 0 : i32
    %22 = arith.cmpi ne, %21, %c0_i32_19 : i32
    scf.if %22 {
      %c0_20 = arith.constant 0 : index
      %c0_21 = arith.constant 0 : index
      %23 = vector.load %arg8[%c0_20, %c0_21] : memref<8x128xf32, #tpu.memory_space<vmem>>, vector<8x128xf32>
      %24 = arith.addf %23, %16 : vector<8x128xf32>
      %c0_22 = arith.constant 0 : index
      %c0_23 = arith.constant 0 : index
      %25 = vector.load %arg8[%c0_22, %c0_23] : memref<8x128xf32, #tpu.memory_space<vmem>>, vector<8x128xf32>
      tpu.vector_store %arg8[%c0_22, %c0_23], %24 {strides = array<i32>} : memref<8x128xf32, #tpu.memory_space<vmem>>, vector<8x128xf32>,
    } else {
    }
    return
  }
  func.func @transform_0(%arg0: i32) -> (i32, i32) {
    %c0_i32 = arith.constant 0 : i32
    %c0_i32_0 = arith.constant 0 : i32
    return %arg0, %c0_i32 : i32, i32
  }
  func.func @transform_1(%arg0: i32) -> (i32, i32) {
    %c0_i32 = arith.constant 0 : i32
    %c0_i32_0 = arith.constant 0 : i32
    return %arg0, %c0_i32 : i32, i32
  }
  func.func @transform_2(%arg0: i32) -> (i32, i32) {
    %c0_i32 = arith.constant 0 : i32
    %c0_i32_0 = arith.constant 0 : i32
    %c0_i32_1 = arith.constant 0 : i32
    return %c0_i32, %c0_i32_0 : i32, i32
  }
  func.func @transform_3(%arg0: i32) -> (i32, i32) {
    %c0_i32 = arith.constant 0 : i32
    %c0_i32_0 = arith.constant 0 : i32
    %c0_i32_1 = arith.constant 0 : i32
    return %c0_i32, %c0_i32_0 : i32, i32
  }
  func.func @transform_4(%arg0: i32) -> (i32, i32) {
    %c0_i32 = arith.constant 0 : i32
    %c0_i32_0 = arith.constant 0 : i32
    %c0_i32_1 = arith.constant 0 : i32
    return %c0_i32, %c0_i32_0 : i32, i32
  }
  func.func @transform_5(%arg0: i32) -> (i32, i32) {
    %c0_i32 = arith.constant 0 : i32
    %c0_i32_0 = arith.constant 0 : i32
    %c0_i32_1 = arith.constant 0 : i32
    return %c0_i32, %c0_i32_0 : i32, i32
  }
  func.func @transform_6(%arg0: i32) -> (i32, i32) {
    %c0_i32 = arith.constant 0 : i32
    %c0_i32_0 = arith.constant 0 : i32
    return %c0_i32, %arg0 : i32, i32
  }
  func.func @transform_7(%arg0: i32) -> (i32, i32) {
    %c0_i32 = arith.constant 0 : i32
    %c0_i32_0 = arith.constant 0 : i32
    %c0_i32_1 = arith.constant 0 : i32
    return %c0_i32, %c0_i32_0 : i32, i32
  }
}

</mosaic_0001>

<bundles_post_ra>
// kernel: _mpn_impl.2
= control target key start
LH: loop header
LB: loop body
LE: loop exit
PB: predicated region body
PF: predicated region fallthrough
CT: control target
= control target key end

     0   :  { %s1690_s15 = smov 0   ;;  %s1692_s16 = smov 0   ;;  %s1903_s0 = inlined_call_operand.vmem [shape: bf16[128,128], index: 0, kind: input, shape index: {}]   ;;  %s1904_s1 = inlined_call_operand.vmem [shape: bf16[128,128], index: 1, kind: input, shape index: {}]   ;;  %s1905_s2 = inlined_call_operand.vmem [shape: bf16[128,128], index: 2, kind: input, shape index: {}]   ;;  %s1906_s3 = inlined_call_operand.vmem [shape: bf16[128,128], index: 3, kind: input, shape index: {}]   ;;  %s1907_s4 = inlined_call_operand.vmem [shape: bf16[128,128], index: 4, kind: output, shape index: {}]  }
   0x1   :  { %s1694_s17 = smov 0  }
   0x2 LB: > { %s26_s18 = sadd.s32 1, %s1659_s16  ;;  %p1226_p0 = scmp.ge.s32.totalorder %s1663_s17, 1  ;;  %s1663_s17 = sphi %s1694_s17, %s14_s17   ;;  %s1659_s16 = sphi %s1692_s16, %s1909_s16   ;;  %s1655_s15 = sphi %s1690_s15, %s1908_s15  }
   0x3   : > { %p28_p1 = scmp.ge.s32.totalorder %s26_s18, 3  ;;  %p202_p2 = scmp.lt.s32.totalorder %s1663_s17, 4 }
   0x5   : > { %s1911_s18 = smov (%p28_p1, %s26_s18), 0  ;;  %p203_p3 = pnand %p1226_p0, %p202_p2 }
   0x6   : > { %p1227_p4 = scmp.ne.s32.totalorder (!%p203_p3), %s1655_s15, 0 }
   0x7   : > { %206 = sbr.rel (%p203_p3) target bundleno = 783 (0x30f), region = 36 }
   0xe   : > { %268 = sbr.rel (%p1227_p4) target bundleno = 279 (0x117), region = 40  ;;  %v1609_v0 = vld [vmem:[%s1905_s2] sm:$0xff] (!%p1227_p4)   ;;  %v1610_v1 = vld [vmem:[%s1905_s2 + $0x8] sm:$0xff] (!%p1227_p4)   ;;  %v1611_v2 = vld [vmem:[%s1905_s2 + $0x10] sm:$0xff] (!%p1227_p4)  }
   0xf   : > { %1473 = vmatprep.subr.bf16.mxu0 (!%p1227_p4), %v1609_v0  ;;  %1569 = vmatprep.subr.bf16.mxu1 (!%p1227_p4), %v1609_v0  ;;  %v1612_v3 = vld [vmem:[%s1905_s2 + $0x18] sm:$0xff] (!%p1227_p4)   ;;  %v1617_v4 = vld [vmem:[%s1903_s0] sm:$0xff] (!%p1227_p4)   ;;  %v1614_v7 = vld [vmem:[%s1905_s2 + $0x28] sm:$0xff] (!%p1227_p4)  }
  0x10   : > { %1474 = vmatpush3.bf16.msra.mxu0 (!%p1227_p4), %v1609_v0  ;;  %1577 = vmatpush3.bf16.msra.mxu1 (!%p1227_p4), %v1609_v0  ;;  %v1618_v5 = vld [vmem:[%s1903_s0 + $0x20] sm:$0xff] (!%p1227_p4)   ;;  %v1615_v8 = vld [vmem:[%s1905_s2 + $0x30] sm:$0xff] (!%p1227_p4)   ;;  %v1616_v9 = vld [vmem:[%s1905_s2 + $0x38] sm:$0xff] (!%p1227_p4)  }
  0x11   : > { %1475 = vmatprep.subr.bf16.mxu0 (!%p1227_p4), %v1610_v1  ;;  %1570 = vmatprep.subr.bf16.mxu1 (!%p1227_p4), %v1610_v1  ;;  %v1613_v6 = vld [vmem:[%s1905_s2 + $0x20] sm:$0xff] (!%p1227_p4)   ;;  %v1619_v10 = vld [vmem:[%s1903_s0 + $0x8] sm:$0xff] (!%p1227_p4)   ;;  %v1621_v12 = vld [vmem:[%s1903_s0 + $0x10] sm:$0xff] (!%p1227_p4)  }
  0x12   : > { %1489 = vmatprep.mubr.bf16.mxu0 (!%p1227_p4), %v1617_v4  ;;  %1497 = vmatprep.mubr.bf16.mxu1 (!%p1227_p4), %v1618_v5  ;;  %v1620_v11 = vld [vmem:[%s1903_s0 + $0x28] sm:$0xff] (!%p1227_p4)   ;;  %v1622_v13 = vld [vmem:[%s1903_s0 + $0x30] sm:$0xff] (!%p1227_p4)   ;;  %v1623_v14 = vld [vmem:[%s1903_s0 + $0x18] sm:$0xff] (!%p1227_p4)  }
  0x13   : > { %v1624_v15 = vld [vmem:[%s1903_s0 + $0x38] sm:$0xff] (!%p1227_p4)  }
  0x14   : > { %1476 = vmatpush3.bf16.msra.mxu0 (!%p1227_p4), %v1610_v1  ;;  %1578 = vmatpush3.bf16.msra.mxu1 (!%p1227_p4), %v1610_v1 }
  0x15   : > { %1477 = vmatprep.subr.bf16.mxu0 %v1611_v2  ;;  %1571 = vmatprep.subr.bf16.mxu1 %v1611_v2 }
  0x18   : > { %1478 = vmatpush3.bf16.msra.mxu0 %v1611_v2  ;;  %1579 = vmatpush3.bf16.msra.mxu1 %v1611_v2 }
  0x19   : > { %1479 = vmatprep.subr.bf16.mxu0 %v1612_v3  ;;  %1572 = vmatprep.subr.bf16.mxu1 %v1612_v3 }
  0x1c   : > { %1480 = vmatpush3.bf16.msra.mxu0 %v1612_v3  ;;  %1580 = vmatpush3.bf16.msra.mxu1 %v1612_v3 }
  0x1d   : > { %1481 = vmatprep.subr.bf16.mxu0 %v1613_v6  ;;  %1573 = vmatprep.subr.bf16.mxu1 %v1613_v6 }
  0x20   : > { %1482 = vmatpush3.bf16.msra.mxu0 %v1613_v6  ;;  %1581 = vmatpush3.bf16.msra.mxu1 %v1613_v6 }
  0x21   : > { %1483 = vmatprep.subr.bf16.mxu0 %v1614_v7  ;;  %1574 = vmatprep.subr.bf16.mxu1 %v1614_v7 }
  0x24   : > { %1484 = vmatpush3.bf16.msra.mxu0 %v1614_v7  ;;  %1582 = vmatpush3.bf16.msra.mxu1 %v1614_v7 }
  0x25   : > { %1485 = vmatprep.subr.bf16.mxu0 %v1615_v8  ;;  %1575 = vmatprep.subr.bf16.mxu1 %v1615_v8 }
  0x28   : > { %1486 = vmatpush3.bf16.msra.mxu0 %v1615_v8  ;;  %1583 = vmatpush3.bf16.msra.mxu1 %v1615_v8 }
  0x29   : > { %1487 = vmatprep.subr.bf16.mxu0 %v1616_v9  ;;  %1576 = vmatprep.subr.bf16.mxu1 %v1616_v9 }
  0x2c   : > { %1488 = vmatpush3.bf16.msra.mxu0 %v1616_v9  ;;  %1584 = vmatpush3.bf16.msra.mxu1 %v1616_v9 }
  0x2f   : > { %1490 = vmatmul.mubr.bf16.vlgmr.msra.gmra.mrb[0].mxu0 %v1619_v10  ;;  %1498 = vmatmul.mubr.bf16.vlgmr.msra.gmra.mrb[0].mxu1 %v1620_v11 }
  0x30   : > { %1493 = vmatprep.mubr.bf16.mxu0 %v1621_v12  ;;  %1501 = vmatprep.mubr.bf16.mxu1 %v1622_v13 }
  0x37   : > { %1494 = vmatmul.mubr.bf16.gmra.mrb[4].mxu0 %v1623_v14  ;;  %1502 = vmatmul.mubr.bf16.gmra.mrb[4].mxu1 %v1624_v15 }
 0x102   : > { %v1491_v16 = vpop.f32.mrb[0].mxu0  ;;  %v1499_v17 = vpop.f32.mrb[0].mxu1 }
 0x103   : > { %v496_v18 = vmax.f32 %v1491_v16, 0.0  ;;  %513 = vst [vmem:[#allocation2 + $0x10] sm:$0xff] %v1491_v16  ;;  %v504_v19 = vmax.f32 %v1499_v17, 0.0  ;;  %521 = vst [vmem:[#allocation2 + $0x50] sm:$0xff] %v1499_v17  ;;  %v431_v20 = vpop.f32.mrb[1].mxu0  ;;  %v463_v21 = vpop.f32.mrb[1].mxu1 }
 0x104   : > { %v494_v22 = vmax.f32 %v431_v20, 0.0  ;;  %511 = vst [vmem:[#allocation2] sm:$0xff] %v431_v20  ;;  %v502_v23 = vmax.f32 %v463_v21, 0.0  ;;  %519 = vst [vmem:[#allocation2 + $0x40] sm:$0xff] %v463_v21  ;;  %v1492_v24 = vpop.f32.mrb[2].mxu0  ;;  %v1500_v25 = vpop.f32.mrb[2].mxu1 }
 0x105   : > { %530 = vst [vmem:[#allocation3 + $0x10] sm:$0xff] %v496_v18  ;;  %538 = vst [vmem:[#allocation3 + $0x50] sm:$0xff] %v504_v19  ;;  %v497_v26 = vmax.f32 %v1492_v24, 0.0  ;;  %v505_v27 = vmax.f32 %v1500_v25, 0.0  ;;  %v434_v28 = vpop.f32.mrb[3].mxu0  ;;  %v466_v29 = vpop.f32.mrb[3].mxu1 }
 0x106   : > { %514 = vst [vmem:[#allocation2 + $0x18] sm:$0xff] %v1492_v24  ;;  %522 = vst [vmem:[#allocation2 + $0x58] sm:$0xff] %v1500_v25  ;;  %v495_v30 = vmax.f32 %v434_v28, 0.0  ;;  %v503_v31 = vmax.f32 %v466_v29, 0.0 }
 0x107   : > { %528 = vst [vmem:[#allocation3] sm:$0xff] %v494_v22  ;;  %536 = vst [vmem:[#allocation3 + $0x40] sm:$0xff] %v502_v23  ;;  %v1339_v32 = vpack.c.bf16 %v497_v26, %v496_v18  ;;  %v1359_v33 = vpack.c.bf16 %v505_v27, %v504_v19 }
 0x108   : > { %512 = vst [vmem:[#allocation2 + $0x8] sm:$0xff] %v434_v28  ;;  %520 = vst [vmem:[#allocation2 + $0x48] sm:$0xff] %v466_v29  ;;  %v1334_v34 = vpack.c.bf16 %v495_v30, %v494_v22  ;;  %v1354_v35 = vpack.c.bf16 %v503_v31, %v502_v23 }
 0x109   : > { %531 = vst [vmem:[#allocation3 + $0x18] sm:$0xff] %v497_v26  ;;  %539 = vst [vmem:[#allocation3 + $0x58] sm:$0xff] %v505_v27 }
 0x10a   : > { %529 = vst [vmem:[#allocation3 + $0x8] sm:$0xff] %v495_v30  ;;  %537 = vst [vmem:[#allocation3 + $0x48] sm:$0xff] %v503_v31  ;;  %v1495_v36 = vpop.f32.mrb[4].mxu0  ;;  %v1503_v37 = vpop.f32.mrb[4].mxu1 }
 0x10b   : > { %1411 = vst [vmem:[%s1907_s4 + $0x8] sm:$0xff] %v1339_v32   ;;  %1415 = vst [vmem:[%s1907_s4 + $0x28] sm:$0xff] %v1359_v33   ;;  %v500_v38 = vmax.f32 %v1495_v36, 0.0  ;;  %v508_v39 = vmax.f32 %v1503_v37, 0.0  ;;  %v447_v40 = vpop.f32.mrb[5].mxu0  ;;  %v479_v41 = vpop.f32.mrb[5].mxu1 }
 0x10c   : > { %1335 = vst [vmem:[%s1907_s4] sm:$0xff] %v1334_v34   ;;  %1414 = vst [vmem:[%s1907_s4 + $0x20] sm:$0xff] %v1354_v35   ;;  %v498_v42 = vmax.f32 %v447_v40, 0.0  ;;  %v506_v43 = vmax.f32 %v479_v41, 0.0  ;;  %v1496_v44 = vpop.f32.mrb[6].mxu0  ;;  %v1504_v45 = vpop.f32.mrb[6].mxu1 }
 0x10d   : > { %517 = vst [vmem:[#allocation2 + $0x30] sm:$0xff] %v1495_v36  ;;  %525 = vst [vmem:[#allocation2 + $0x70] sm:$0xff] %v1503_v37  ;;  %v501_v46 = vmax.f32 %v1496_v44, 0.0  ;;  %v509_v47 = vmax.f32 %v1504_v45, 0.0  ;;  %v450_v48 = vpop.f32.mrb[7].mxu0  ;;  %v482_v49 = vpop.f32.mrb[7].mxu1 }
 0x10e   : > { %515 = vst [vmem:[#allocation2 + $0x20] sm:$0xff] %v447_v40  ;;  %523 = vst [vmem:[#allocation2 + $0x60] sm:$0xff] %v479_v41  ;;  %v499_v50 = vmax.f32 %v450_v48, 0.0  ;;  %v507_v51 = vmax.f32 %v482_v49, 0.0 }
 0x10f   : > { %534 = vst [vmem:[#allocation3 + $0x30] sm:$0xff] %v500_v38  ;;  %542 = vst [vmem:[#allocation3 + $0x70] sm:$0xff] %v508_v39  ;;  %v1349_v52 = vpack.c.bf16 %v501_v46, %v500_v38  ;;  %v1369_v53 = vpack.c.bf16 %v509_v47, %v508_v39 }
 0x110   : > { %518 = vst [vmem:[#allocation2 + $0x38] sm:$0xff] %v1496_v44  ;;  %526 = vst [vmem:[#allocation2 + $0x78] sm:$0xff] %v1504_v45  ;;  %v1344_v54 = vpack.c.bf16 %v499_v50, %v498_v42  ;;  %v1364_v55 = vpack.c.bf16 %v507_v51, %v506_v43 }
 0x111   : > { %532 = vst [vmem:[#allocation3 + $0x20] sm:$0xff] %v498_v42  ;;  %540 = vst [vmem:[#allocation3 + $0x60] sm:$0xff] %v506_v43 }
 0x112   : > { %516 = vst [vmem:[#allocation2 + $0x28] sm:$0xff] %v450_v48  ;;  %524 = vst [vmem:[#allocation2 + $0x68] sm:$0xff] %v482_v49 }
 0x113   : > { %535 = vst [vmem:[#allocation3 + $0x38] sm:$0xff] %v501_v46  ;;  %543 = vst [vmem:[#allocation3 + $0x78] sm:$0xff] %v509_v47 }
 0x114   : > { %533 = vst [vmem:[#allocation3 + $0x28] sm:$0xff] %v499_v50  ;;  %541 = vst [vmem:[#allocation3 + $0x68] sm:$0xff] %v507_v51 }
 0x115   : > { %1413 = vst [vmem:[%s1907_s4 + $0x18] sm:$0xff] %v1349_v52   ;;  %1417 = vst [vmem:[%s1907_s4 + $0x38] sm:$0xff] %v1369_v53  }
 0x116   : > { %1412 = vst [vmem:[%s1907_s4 + $0x10] sm:$0xff] %v1344_v54   ;;  %1416 = vst [vmem:[%s1907_s4 + $0x30] sm:$0xff] %v1364_v55  }
 0x117 PF: > { %p1260_p5 = scmp.le.s32.totalorder %s1655_s15, 0 }
 0x118   : > { %s628_s23 = sadd.s32 (!%p1260_p5), 1, %s1655_s15  ;;  %v1625_v56 = vld [vmem:[%s1904_s1] sm:$0xff] (!%p1260_p5)   ;;  %v1634_v8 = vld [vmem:[%s1906_s3 + $0x8] sm:$0xff] (!%p1260_p5)   ;;  %v1635_v12 = vld [vmem:[%s1906_s3 + $0x10] sm:$0xff] (!%p1260_p5)   ;;  %s630_s11 = sand.u32 (!%p1260_p5), 1, %s1655_s15 }
 0x119   : > { %627 = sbr.rel (%p1260_p5) target bundleno = 783 (0x30f), region = 44  ;;  %s629_s26 = sand.u32 (!%p1260_p5), 1, %s628_s23  ;;  %1521 = vmatprep.mubr.bf16.mxu0 (!%p1260_p5), %v1625_v56  ;;  %v1633_v7 = vld [vmem:[%s1906_s3] sm:$0xff] (!%p1260_p5)   ;;  %v1636_v16 = vld [vmem:[%s1906_s3 + $0x18] sm:$0xff] (!%p1260_p5)   ;;  %v1638_v22 = vld [vmem:[%s1906_s3 + $0x28] sm:$0xff] (!%p1260_p5)  }
 0x11a   : > { %s1261_s27 = sshll.u32 (!%p1260_p5), %s629_s26, 7  ;;  %1537 = vmatprep.subr.bf16.mxu1 (!%p1260_p5), %v1633_v7  ;;  %v1637_v20 = vld [vmem:[%s1906_s3 + $0x20] sm:$0xff] (!%p1260_p5)   ;;  %v1639_v23 = vld [vmem:[%s1906_s3 + $0x30] sm:$0xff] (!%p1260_p5)   ;;  %v1626_v24 = vld [vmem:[%s1904_s1 + $0x8] sm:$0xff] (!%p1260_p5)   ;;  %s1262_s12 = sshll.u32 (!%p1260_p5), %s630_s11, 7 }
 0x11b   : > { %s1788_s28 = scalar_lea.vmem (!%p1260_p5), [#allocation3], %s1261_s27  ;;  %1538 = vmatpush3.bf16.msra.mxu1 (!%p1260_p5), %v1633_v7  ;;  %v1627_v25 = vld [vmem:[%s1904_s1 + $0x10] sm:$0xff] (!%p1260_p5)   ;;  %v1628_v26 = vld [vmem:[%s1904_s1 + $0x18] sm:$0xff] (!%p1260_p5)   ;;  %v1629_v27 = vld [vmem:[%s1904_s1 + $0x20] sm:$0xff] (!%p1260_p5)   ;;  %s1852_s13 = scalar_lea.vmem (!%p1260_p5), [#allocation3], %s1262_s12 }
 0x11c   : > { %v635_v57 = vld [vmem:[%s1788_s28] sm:$0xff] (!%p1260_p5)  ;;  %v636_v58 = vld [vmem:[%s1788_s28 + $0x8] sm:$0xff] (!%p1260_p5)  ;;  %v637_v59 = vld [vmem:[%s1788_s28 + $0x10] sm:$0xff] (!%p1260_p5)  ;;  %1539 = vmatprep.subr.bf16.mxu1 (!%p1260_p5), %v1634_v8 }
 0x11d   : > { %v667_v60 = vpack.c.bf16 (!%p1260_p5), %v636_v58, %v635_v57  ;;  %v638_v61 = vld [vmem:[%s1788_s28 + $0x18] sm:$0xff] (!%p1260_p5)  ;;  %v639_v63 = vld [vmem:[%s1788_s28 + $0x20] sm:$0xff] (!%p1260_p5)  ;;  %v640_v0 = vld [vmem:[%s1788_s28 + $0x28] sm:$0xff] (!%p1260_p5) }
 0x11e   : > { %v668_v62 = vpack.c.bf16 (!%p1260_p5), %v638_v61, %v637_v59  ;;  %v669_v1 = vpack.c.bf16 (!%p1260_p5), %v640_v0, %v639_v63  ;;  %v641_v2 = vld [vmem:[%s1788_s28 + $0x30] sm:$0xff] (!%p1260_p5)  ;;  %v642_v3 = vld [vmem:[%s1788_s28 + $0x38] sm:$0xff] (!%p1260_p5)  ;;  %v643_v4 = vld [vmem:[%s1788_s28 + $0x40] sm:$0xff] (!%p1260_p5) }
 0x11f   : > { %1505 = vmatprep.subr.bf16.mxu0 (!%p1260_p5), %v667_v60  ;;  %v670_v5 = vpack.c.bf16 (!%p1260_p5), %v642_v3, %v641_v2  ;;  %v644_v6 = vld [vmem:[%s1788_s28 + $0x48] sm:$0xff] (!%p1260_p5)  ;;  %v645_v9 = vld [vmem:[%s1788_s28 + $0x50] sm:$0xff] (!%p1260_p5)  ;;  %v646_v11 = vld [vmem:[%s1788_s28 + $0x58] sm:$0xff] (!%p1260_p5)  ;;  %1540 = vmatpush3.bf16.msra.mxu1 (!%p1260_p5), %v1634_v8 }
 0x120   : > { %1506 = vmatpush3.bf16.msra.mxu0 %v667_v60  ;;  %v671_v10 = vpack.c.bf16 %v644_v6, %v643_v4  ;;  %v672_v13 = vpack.c.bf16 %v646_v11, %v645_v9  ;;  %v647_v14 = vld [vmem:[%s1788_s28 + $0x60] sm:$0xff]  ;;  %v648_v15 = vld [vmem:[%s1788_s28 + $0x68] sm:$0xff]  ;;  %1541 = vmatprep.subr.bf16.mxu1 %v1635_v12  ;;  %v649_v18 = vld [vmem:[%s1788_s28 + $0x70] sm:$0xff] }
 0x121   : > { %1507 = vmatprep.subr.bf16.mxu0 %v668_v62  ;;  %v673_v17 = vpack.c.bf16 %v648_v15, %v647_v14  ;;  %v650_v19 = vld [vmem:[%s1788_s28 + $0x78] sm:$0xff]  ;;  %v1630_v28 = vld [vmem:[%s1904_s1 + $0x28] sm:$0xff]   ;;  %v1631_v29 = vld [vmem:[%s1904_s1 + $0x30] sm:$0xff]  }
 0x122   : > { %v674_v21 = vpack.c.bf16 %v650_v19, %v649_v18  ;;  %v1632_v30 = vld [vmem:[%s1904_s1 + $0x38] sm:$0xff]   ;;  %v992_v56 = vld [vmem:[#allocation2 + $0x10] sm:$0xff]  ;;  %v990_v57 = vld [vmem:[#allocation2] sm:$0xff] }
 0x123   : > { %1542 = vmatpush3.bf16.msra.mxu1 %v1635_v12  ;;  %v1640_v31 = vld [vmem:[%s1906_s3 + $0x38] sm:$0xff]   ;;  %v996_v8 = vld [vmem:[#allocation2 + $0x30] sm:$0xff] }
 0x124   : > { %1508 = vmatpush3.bf16.msra.mxu0 %v668_v62  ;;  %1543 = vmatprep.subr.bf16.mxu1 %v1636_v16  ;;  %v993_v59 = vld [vmem:[#allocation2 + $0x18] sm:$0xff]  ;;  %v991_v62 = vld [vmem:[#allocation2 + $0x8] sm:$0xff] }
 0x125   : > { %1509 = vmatprep.subr.bf16.mxu0 %v669_v1 }
 0x127   : > { %1544 = vmatpush3.bf16.msra.mxu1 %v1636_v16  ;;  %v995_v16 = vld [vmem:[#allocation2 + $0x28] sm:$0xff] }
 0x128   : > { %1510 = vmatpush3.bf16.msra.mxu0 %v669_v1  ;;  %1545 = vmatprep.subr.bf16.mxu1 %v1637_v20 }
 0x129   : > { %1511 = vmatprep.subr.bf16.mxu0 %v670_v5 }
 0x12b   : > { %1546 = vmatpush3.bf16.msra.mxu1 %v1637_v20 }
 0x12c   : > { %1512 = vmatpush3.bf16.msra.mxu0 %v670_v5  ;;  %1547 = vmatprep.subr.bf16.mxu1 %v1638_v22 }
 0x12d   : > { %1513 = vmatprep.subr.bf16.mxu0 %v671_v10 }
 0x12f   : > { %1548 = vmatpush3.bf16.msra.mxu1 %v1638_v22 }
 0x130   : > { %1514 = vmatpush3.bf16.msra.mxu0 %v671_v10  ;;  %1549 = vmatprep.subr.bf16.mxu1 %v1639_v23  ;;  %v994_v10 = vld [vmem:[#allocation2 + $0x20] sm:$0xff] }
 0x131   : > { %1515 = vmatprep.subr.bf16.mxu0 %v672_v13 }
 0x133   : > { %1550 = vmatpush3.bf16.msra.mxu1 %v1639_v23 }
 0x134   : > { %1516 = vmatpush3.bf16.msra.mxu0 %v672_v13  ;;  %1551 = vmatprep.subr.bf16.mxu1 %v1640_v31  ;;  %v997_v13 = vld [vmem:[#allocation2 + $0x38] sm:$0xff] }
 0x135   : > { %1517 = vmatprep.subr.bf16.mxu0 %v673_v17 }
 0x137   : > { %1552 = vmatpush3.bf16.msra.mxu1 %v1640_v31  ;;  %v1001_v31 = vld [vmem:[#allocation2 + $0x58] sm:$0xff] }
 0x138   : > { %1518 = vmatpush3.bf16.msra.mxu0 %v673_v17 }
 0x139   : > { %1519 = vmatprep.subr.bf16.mxu0 %v674_v21 }
 0x13c   : > { %1520 = vmatpush3.bf16.msra.mxu0 %v674_v21 }
 0x13f   : > { %1522 = vmatmul.mubr.bf16.vlgmr.msra.gmra.mrb[0].mxu0 %v1626_v24 }
 0x140   : > { %1525 = vmatprep.mubr.bf16.mxu0 %v1627_v25 }
 0x147   : > { %1526 = vmatmul.mubr.bf16.gmra.mrb[4].mxu0 %v1628_v26  ;;  %v1000_v26 = vld [vmem:[#allocation2 + $0x50] sm:$0xff] }
 0x148   : > { %1529 = vmatprep.mubr.bf16.mxu0 %v1629_v27 }
 0x14f   : > { %1530 = vmatmul.mubr.bf16.gmra.mrb[8].mxu0 %v1630_v28  ;;  %v998_v28 = vld [vmem:[#allocation2 + $0x40] sm:$0xff] }
 0x150   : > { %1533 = vmatprep.mubr.bf16.mxu0 %v1631_v29 }
 0x157   : > { %1534 = vmatmul.mubr.bf16.gmra.mrb[12].mxu0 %v1632_v30 }
 0x212   : > { %v1523_v32 = vpop.f32.mrb[0].mxu0 }
 0x213   : > { %v757_v33 = vpop.f32.mrb[1].mxu0 }
 0x214   : > { %v1524_v34 = vpop.f32.mrb[2].mxu0 }
 0x215   : > { %v821_v35 = vpack.c.bf16 %v1524_v34, %v1523_v32  ;;  %v760_v36 = vpop.f32.mrb[3].mxu0  ;;  %v999_v34 = vld [vmem:[#allocation2 + $0x48] sm:$0xff] }
 0x216   : > { %v820_v37 = vpack.c.bf16 %v760_v36, %v757_v33 }
 0x218   : > { %1553 = vmatprep.mubr.bf16.mxu1 %v820_v37 }
 0x219   : > { %1554 = vmatmul.mubr.bf16.vlgmr.msra.gmra.mrb[0].mxu1 %v821_v35 }
 0x21a   : > { %v1527_v38 = vpop.f32.mrb[4].mxu0 }
 0x21b   : > { %v773_v39 = vpop.f32.mrb[5].mxu0 }
 0x21c   : > { %v1528_v40 = vpop.f32.mrb[6].mxu0 }
 0x21d   : > { %v823_v41 = vpack.c.bf16 %v1528_v40, %v1527_v38  ;;  %v776_v42 = vpop.f32.mrb[7].mxu0 }
 0x21e   : > { %v822_v43 = vpack.c.bf16 %v776_v42, %v773_v39 }
 0x220   : > { %1557 = vmatprep.mubr.bf16.mxu1 %v822_v43 }
 0x221   : > { %1558 = vmatmul.mubr.bf16.gmra.mrb[4].mxu1 %v823_v41 }
 0x222   : > { %v1531_v44 = vpop.f32.mrb[8].mxu0 }
 0x223   : > { %v789_v45 = vpop.f32.mrb[9].mxu0 }
 0x224   : > { %v1532_v46 = vpop.f32.mrb[10].mxu0 }
 0x225   : > { %v825_v47 = vpack.c.bf16 %v1532_v46, %v1531_v44  ;;  %v792_v48 = vpop.f32.mrb[11].mxu0  ;;  %v1004_v44 = vld [vmem:[#allocation2 + $0x70] sm:$0xff]  ;;  %v1002_v46 = vld [vmem:[#allocation2 + $0x60] sm:$0xff] }
 0x226   : > { %v824_v49 = vpack.c.bf16 %v792_v48, %v789_v45 }
 0x228   : > { %1561 = vmatprep.mubr.bf16.mxu1 %v824_v49  ;;  %v1005_v49 = vld [vmem:[#allocation2 + $0x78] sm:$0xff] }
 0x229   : > { %1562 = vmatmul.mubr.bf16.gmra.mrb[8].mxu1 %v825_v47 }
 0x22a   : > { %v1535_v50 = vpop.f32.mrb[12].mxu0 }
 0x22b   : > { %v805_v51 = vpop.f32.mrb[13].mxu0 }
 0x22c   : > { %v1536_v52 = vpop.f32.mrb[14].mxu0 }
 0x22d   : > { %v827_v53 = vpack.c.bf16 %v1536_v52, %v1535_v50  ;;  %v808_v54 = vpop.f32.mrb[15].mxu0  ;;  %v1003_v52 = vld [vmem:[#allocation2 + $0x68] sm:$0xff] }
 0x22e   : > { %v826_v55 = vpack.c.bf16 %v808_v54, %v805_v51 }
 0x230   : > { %1565 = vmatprep.mubr.bf16.mxu1 %v826_v55 }
 0x231   : > { %1566 = vmatmul.mubr.bf16.gmra.mrb[12].mxu1 %v827_v53 }
 0x2ec   : > { %v1555_v58 = vpop.f32.mrb[0].mxu1 }
 0x2ed   : > { %v1008_v60 = vadd.f32 %v1555_v58, %v992_v56  ;;  %v926_v61 = vpop.f32.mrb[1].mxu1 }
 0x2ee   : > { %v1006_v63 = vadd.f32 %v990_v57, %v926_v61  ;;  %v1556_v0 = vpop.f32.mrb[2].mxu1 }
 0x2ef   : > { %v1024_v1 = vmax.f32 %v1008_v60, 0.0  ;;  %v1009_v2 = vadd.f32 %v1556_v0, %v993_v59  ;;  %v929_v3 = vpop.f32.mrb[3].mxu1 }
 0x2f0   : > { %v1022_v4 = vmax.f32 %v1006_v63, 0.0  ;;  %v1007_v5 = vadd.f32 %v991_v62, %v929_v3 }
 0x2f1   : > { %1041 = vst [vmem:[%s1852_s13 + $0x10] sm:$0xff] %v1024_v1  ;;  %v1025_v6 = vmax.f32 %v1009_v2, 0.0 }
 0x2f2   : > { %1039 = vst [vmem:[%s1852_s13] sm:$0xff] %v1022_v4  ;;  %v1023_v7 = vmax.f32 %v1007_v5, 0.0 }
 0x2f3   : > { %1042 = vst [vmem:[%s1852_s13 + $0x18] sm:$0xff] %v1025_v6  ;;  %v1379_v9 = vpack.c.bf16 %v1025_v6, %v1024_v1 }
 0x2f4   : > { %1040 = vst [vmem:[%s1852_s13 + $0x8] sm:$0xff] %v1023_v7  ;;  %v1374_v11 = vpack.c.bf16 %v1023_v7, %v1022_v4  ;;  %v1559_v12 = vpop.f32.mrb[4].mxu1 }
 0x2f5   : > { %1418 = vst [vmem:[%s1907_s4 + $0x8] sm:$0xff] %v1379_v9   ;;  %v1012_v14 = vadd.f32 %v1559_v12, %v996_v8  ;;  %v942_v15 = vpop.f32.mrb[5].mxu1 }
 0x2f6   : > { %1375 = vst [vmem:[%s1907_s4] sm:$0xff] %v1374_v11   ;;  %v1010_v17 = vadd.f32 %v994_v10, %v942_v15  ;;  %v1560_v18 = vpop.f32.mrb[6].mxu1 }
 0x2f7   : > { %v1028_v19 = vmax.f32 %v1012_v14, 0.0  ;;  %v1013_v20 = vadd.f32 %v1560_v18, %v997_v13  ;;  %v945_v21 = vpop.f32.mrb[7].mxu1 }
 0x2f8   : > { %v1026_v22 = vmax.f32 %v1010_v17, 0.0  ;;  %v1011_v23 = vadd.f32 %v995_v16, %v945_v21 }
 0x2f9   : > { %1045 = vst [vmem:[%s1852_s13 + $0x30] sm:$0xff] %v1028_v19  ;;  %v1029_v24 = vmax.f32 %v1013_v20, 0.0 }
 0x2fa   : > { %1043 = vst [vmem:[%s1852_s13 + $0x20] sm:$0xff] %v1026_v22  ;;  %v1027_v25 = vmax.f32 %v1011_v23, 0.0 }
 0x2fb   : > { %1046 = vst [vmem:[%s1852_s13 + $0x38] sm:$0xff] %v1029_v24  ;;  %v1389_v27 = vpack.c.bf16 %v1029_v24, %v1028_v19 }
 0x2fc   : > { %1044 = vst [vmem:[%s1852_s13 + $0x28] sm:$0xff] %v1027_v25  ;;  %v1384_v29 = vpack.c.bf16 %v1027_v25, %v1026_v22  ;;  %v1563_v30 = vpop.f32.mrb[8].mxu1 }
 0x2fd   : > { %1420 = vst [vmem:[%s1907_s4 + $0x18] sm:$0xff] %v1389_v27   ;;  %v1016_v32 = vadd.f32 %v1563_v30, %v1000_v26  ;;  %v958_v33 = vpop.f32.mrb[9].mxu1 }
 0x2fe   : > { %1419 = vst [vmem:[%s1907_s4 + $0x10] sm:$0xff] %v1384_v29   ;;  %v1014_v35 = vadd.f32 %v998_v28, %v958_v33  ;;  %v1564_v36 = vpop.f32.mrb[10].mxu1 }
 0x2ff   : > { %v1032_v37 = vmax.f32 %v1016_v32, 0.0  ;;  %v1017_v38 = vadd.f32 %v1564_v36, %v1001_v31  ;;  %v961_v39 = vpop.f32.mrb[11].mxu1 }
 0x300   : > { %v1030_v40 = vmax.f32 %v1014_v35, 0.0  ;;  %v1015_v41 = vadd.f32 %v999_v34, %v961_v39 }
 0x301   : > { %1049 = vst [vmem:[%s1852_s13 + $0x50] sm:$0xff] %v1032_v37  ;;  %v1033_v42 = vmax.f32 %v1017_v38, 0.0 }
 0x302   : > { %1047 = vst [vmem:[%s1852_s13 + $0x40] sm:$0xff] %v1030_v40  ;;  %v1031_v43 = vmax.f32 %v1015_v41, 0.0 }
 0x303   : > { %1050 = vst [vmem:[%s1852_s13 + $0x58] sm:$0xff] %v1033_v42  ;;  %v1399_v45 = vpack.c.bf16 %v1033_v42, %v1032_v37 }
 0x304   : > { %1048 = vst [vmem:[%s1852_s13 + $0x48] sm:$0xff] %v1031_v43  ;;  %v1394_v47 = vpack.c.bf16 %v1031_v43, %v1030_v40  ;;  %v1567_v48 = vpop.f32.mrb[12].mxu1 }
 0x305   : > { %1422 = vst [vmem:[%s1907_s4 + $0x28] sm:$0xff] %v1399_v45   ;;  %v1020_v50 = vadd.f32 %v1567_v48, %v1004_v44  ;;  %v974_v51 = vpop.f32.mrb[13].mxu1 }
 0x306   : > { %1421 = vst [vmem:[%s1907_s4 + $0x20] sm:$0xff] %v1394_v47   ;;  %v1018_v53 = vadd.f32 %v1002_v46, %v974_v51  ;;  %v1568_v54 = vpop.f32.mrb[14].mxu1 }
 0x307   : > { %v1036_v55 = vmax.f32 %v1020_v50, 0.0  ;;  %v1021_v56 = vadd.f32 %v1568_v54, %v1005_v49  ;;  %v977_v57 = vpop.f32.mrb[15].mxu1 }
 0x308   : > { %v1034_v58 = vmax.f32 %v1018_v53, 0.0  ;;  %v1019_v59 = vadd.f32 %v1003_v52, %v977_v57 }
 0x309   : > { %1053 = vst [vmem:[%s1852_s13 + $0x70] sm:$0xff] %v1036_v55  ;;  %v1037_v60 = vmax.f32 %v1021_v56, 0.0 }
 0x30a   : > { %1051 = vst [vmem:[%s1852_s13 + $0x60] sm:$0xff] %v1034_v58  ;;  %v1035_v61 = vmax.f32 %v1019_v59, 0.0 }
 0x30b   : > { %1054 = vst [vmem:[%s1852_s13 + $0x78] sm:$0xff] %v1037_v60  ;;  %v1409_v62 = vpack.c.bf16 %v1037_v60, %v1036_v55 }
 0x30c   : > { %1052 = vst [vmem:[%s1852_s13 + $0x68] sm:$0xff] %v1035_v61  ;;  %v1404_v63 = vpack.c.bf16 %v1035_v61, %v1034_v58 }
 0x30d   : > { %1424 = vst [vmem:[%s1907_s4 + $0x38] sm:$0xff] %v1409_v62  }
 0x30e   : > { %1423 = vst [vmem:[%s1907_s4 + $0x30] sm:$0xff] %v1404_v63  }
 0x30f PF: > { %s14_s17 = sadd.s32 1, %s1663_s17   ;;  %s1908_s15 = smov %s1659_s16 }
 0x310   : > { %p11_p6 = scmp.ge.s32.totalorder %s14_s17, 5   ;;  %s1909_s16 = smov %s1911_s18 }
 0x312   :  { %13 = sbr.rel (!%p11_p6) target bundleno = 2 (0x2), region = 82 }

// kernel: _mpn_impl.3
= control target key start
LH: loop header
LB: loop body
LE: loop exit
PB: predicated region body
PF: predicated region fallthrough
CT: control target
= control target key end

     0   :  { %s1318_s0 = inlined_call_operand.vmem [shape: bf16[128,128], index: 0, kind: input, shape index: {}]   ;;  %s1319_s1 = inlined_call_operand.vmem [shape: bf16[128,128], index: 1, kind: input, shape index: {}]   ;;  %s1320_s2 = inlined_call_operand.vmem [shape: bf16[128,128], index: 2, kind: input, shape index: {}]   ;;  %s1321_s3 = inlined_call_operand.vmem [shape: bf16[128,128], index: 3, kind: input, shape index: {}]   ;;  %s1322_s4 = inlined_call_operand.vmem [shape: bf16[128,128], index: 4, kind: input, shape index: {}]   ;;  %s1323_s5 = inlined_call_operand.vmem [shape: f32[1,128], index: 5, kind: input, shape index: {}]   ;;  %s1324_s6 = inlined_call_operand.vmem [shape: f32[8,128], index: 6, kind: input, shape index: {}]   ;;  %s1325_s7 = inlined_call_operand.hbm [shape: f32[8,128], index: 7, kind: output, shape index: {}]  }
   0x1   :  { %v1064_v0 = vld [vmem:[%s1320_s2] sm:$0xff]   ;;  %v1065_v1 = vld [vmem:[%s1320_s2 + $0x8] sm:$0xff]   ;;  %v1066_v2 = vld [vmem:[%s1320_s2 + $0x10] sm:$0xff]  }
   0x2   :  { %889 = vmatprep.subr.bf16.mxu0 %v1064_v0  ;;  %v1067_v3 = vld [vmem:[%s1320_s2 + $0x18] sm:$0xff]   ;;  %v1072_v4 = vld [vmem:[%s1319_s1] sm:$0xff]   ;;  %v1069_v6 = vld [vmem:[%s1320_s2 + $0x28] sm:$0xff]  }
   0x3   :  { %890 = vmatpush3.bf16.msra.mxu0 %v1064_v0  ;;  %905 = vmatprep.mubr.bf16.mxu0 %v1072_v4  ;;  %v1068_v5 = vld [vmem:[%s1320_s2 + $0x20] sm:$0xff]   ;;  %v1081_v8 = vld [vmem:[%s1322_s4 + $0x8] sm:$0xff]   ;;  %v1070_v9 = vld [vmem:[%s1320_s2 + $0x30] sm:$0xff]  }
   0x4   :  { %891 = vmatprep.subr.bf16.mxu0 %v1065_v1  ;;  %v1080_v7 = vld [vmem:[%s1322_s4] sm:$0xff]   ;;  %v1082_v10 = vld [vmem:[%s1322_s4 + $0x10] sm:$0xff]   ;;  %v1071_v11 = vld [vmem:[%s1320_s2 + $0x38] sm:$0xff]  }
   0x5   :  { %921 = vmatprep.subr.bf16.mxu1 %v1080_v7  ;;  %v1083_v12 = vld [vmem:[%s1322_s4 + $0x18] sm:$0xff]   ;;  %v1084_v13 = vld [vmem:[%s1322_s4 + $0x20] sm:$0xff]   ;;  %v1073_v14 = vld [vmem:[%s1319_s1 + $0x8] sm:$0xff]  }
   0x6   :  { %922 = vmatpush3.bf16.msra.mxu1 %v1080_v7  ;;  %v1074_v15 = vld [vmem:[%s1319_s1 + $0x10] sm:$0xff]   ;;  %v1085_v16 = vld [vmem:[%s1322_s4 + $0x28] sm:$0xff]  }
   0x7   :  { %892 = vmatpush3.bf16.msra.mxu0 %v1065_v1  ;;  %923 = vmatprep.subr.bf16.mxu1 %v1081_v8 }
   0x8   :  { %893 = vmatprep.subr.bf16.mxu0 %v1066_v2 }
   0xa   :  { %924 = vmatpush3.bf16.msra.mxu1 %v1081_v8 }
   0xb   :  { %894 = vmatpush3.bf16.msra.mxu0 %v1066_v2  ;;  %925 = vmatprep.subr.bf16.mxu1 %v1082_v10 }
   0xc   :  { %895 = vmatprep.subr.bf16.mxu0 %v1067_v3 }
   0xe   :  { %926 = vmatpush3.bf16.msra.mxu1 %v1082_v10 }
   0xf   :  { %896 = vmatpush3.bf16.msra.mxu0 %v1067_v3  ;;  %927 = vmatprep.subr.bf16.mxu1 %v1083_v12 }
  0x10   :  { %897 = vmatprep.subr.bf16.mxu0 %v1068_v5 }
  0x12   :  { %928 = vmatpush3.bf16.msra.mxu1 %v1083_v12 }
  0x13   :  { %898 = vmatpush3.bf16.msra.mxu0 %v1068_v5  ;;  %929 = vmatprep.subr.bf16.mxu1 %v1084_v13 }
  0x14   :  { %899 = vmatprep.subr.bf16.mxu0 %v1069_v6 }
  0x17   :  { %900 = vmatpush3.bf16.msra.mxu0 %v1069_v6 }
  0x18   :  { %901 = vmatprep.subr.bf16.mxu0 %v1070_v9 }
  0x1b   :  { %902 = vmatpush3.bf16.msra.mxu0 %v1070_v9 }
  0x1c   :  { %903 = vmatprep.subr.bf16.mxu0 %v1071_v11 }
  0x1f   :  { %904 = vmatpush3.bf16.msra.mxu0 %v1071_v11 }
  0x22   :  { %906 = vmatmul.mubr.bf16.vlgmr.msra.gmra.mrb[0].mxu0 %v1073_v14 }
  0x23   :  { %12 = vsyncpa [#allocation3], 0  ;;  %909 = vmatprep.mubr.bf16.mxu0 %v1074_v15  ;;  %930 = vmatpush3.bf16.msra.mxu1 %v1084_v13  ;;  %v1086_v17 = vld [vmem:[%s1322_s4 + $0x30] sm:$0xff]   ;;  %v1075_v18 = vld [vmem:[%s1319_s1 + $0x18] sm:$0xff]   ;;  %v1128_v0 = vmov 0.0|0.0   ;;  %vm1129_vm0 = vmmov 0  }
  0x24   :  { %931 = vmatprep.subr.bf16.mxu1 %v1085_v16  ;;  %v1076_v19 = vld [vmem:[%s1319_s1 + $0x20] sm:$0xff]   ;;  %v1077_v20 = vld [vmem:[%s1319_s1 + $0x28] sm:$0xff]   ;;  %v1078_v21 = vld [vmem:[%s1319_s1 + $0x30] sm:$0xff]   ;;  %1020 = vmatprep.subr.bf16.mxu0 %v1128_v0  ;;  %v1130_v1 = vmov 0.0   ;;  %s1131_s30 = smov [#allocation2]  }
  0x25   :  { %v1079_v22 = vld [vmem:[%s1319_s1 + $0x38] sm:$0xff]   ;;  %v1088_v24 = vld [vmem:[%s1321_s3] sm:$0xff]   ;;  %v1089_v31 = vld [vmem:[%s1321_s3 + $0x8] sm:$0xff]   ;;  %s775_s2 = sshll.u32 %s1131_s30, 4  ;;  %s776_s2 = int_to_ptr.vmem [resolvable:$true] %s775_s2 }
  0x26   :  { %v1087_v23 = vld [vmem:[%s1322_s4 + $0x38] sm:$0xff]   ;;  %v1090_v34 = vld [vmem:[%s1321_s3 + $0x10] sm:$0xff]   ;;  %v1092_v42 = vld [vmem:[%s1321_s3 + $0x20] sm:$0xff]   ;;  %s1104_s8 = scalar_lea.vmem %s776_s2, 128  ;;  %p1109_p1 = scmp.lt.s32.totalorder %s776_s2, %s776_s2 }
  0x27   :  { %932 = vmatpush3.bf16.msra.mxu1 %v1085_v16  ;;  %v1091_v39 = vld [vmem:[%s1321_s3 + $0x18] sm:$0xff]   ;;  %v1093_v47 = vld [vmem:[%s1321_s3 + $0x28] sm:$0xff]   ;;  %v1094_v50 = vld [vmem:[%s1321_s3 + $0x30] sm:$0xff]   ;;  %p1105_p0 = scmp.ne.s32.totalorder %s776_s2, %s1104_s8  ;;  %p1110_p2 = scmp.lt.s32.totalorder %s1104_s8, %s1104_s8 }
  0x28   :  { %933 = vmatprep.subr.bf16.mxu1 %v1086_v17  ;;  %v1096_v55 = vld [vmem:[%s1318_s0] sm:$0xff]   ;;  %v1095_v56 = vld [vmem:[%s1321_s3 + $0x38] sm:$0xff]   ;;  %v1097_v57 = vld [vmem:[%s1318_s0 + $0x8] sm:$0xff]  }
  0x29   :  { %v1098_v58 = vld [vmem:[%s1318_s0 + $0x10] sm:$0xff]   ;;  %v1099_v59 = vld [vmem:[%s1318_s0 + $0x18] sm:$0xff]   ;;  %v1100_v60 = vld [vmem:[%s1318_s0 + $0x20] sm:$0xff]   ;;  %p1111_p3 = por %p1110_p2, %p1109_p1 }
  0x2a   :  { %910 = vmatmul.mubr.bf16.gmra.mrb[4].mxu0 %v1075_v18  ;;  %v1101_v61 = vld [vmem:[%s1318_s0 + $0x28] sm:$0xff]   ;;  %v1102_v62 = vld [vmem:[%s1318_s0 + $0x30] sm:$0xff]   ;;  %v1103_v63 = vld [vmem:[%s1318_s0 + $0x38] sm:$0xff]  }
  0x2b   :  { %913 = vmatprep.mubr.bf16.mxu0 %v1076_v19  ;;  %934 = vmatpush3.bf16.msra.mxu1 %v1086_v17  ;;  %v823_v2 = vld [vmem:[%s1323_s5] ss:$0 sm:$0xff]  ;;  %p1112_p4 = pnand %p1111_p3, %p1105_p0 }
  0x2c   :  { %935 = vmatprep.subr.bf16.mxu1 %v1087_v23 }
  0x2f   :  { %936 = vmatpush3.bf16.msra.mxu1 %v1087_v23 }
  0x30   :  { %953 = vmatprep.subr.bf16.mxu1 %v1088_v24 }
  0x32   :  { %914 = vmatmul.mubr.bf16.gmra.mrb[8].mxu0 %v1077_v20 }
  0x33   :  { %917 = vmatprep.mubr.bf16.mxu0 %v1078_v21 }
  0x3a   :  { %918 = vmatmul.mubr.bf16.gmra.mrb[12].mxu0 %v1079_v22 }
  0x3b   :  { %1017 = vmatprep.mubr.msk.f32.mxu0 %vm1129_vm0, %v1130_v1 }
  0xf5   :  { %v907_v25 = vpop.f32.mrb[0].mxu0 }
  0xf6   :  { %v190_v26 = vpop.f32.mrb[1].mxu0 }
  0xf7   :  { %v908_v27 = vpop.f32.mrb[2].mxu0 }
  0xf8   :  { %v286_v28 = vpack.c.bf16 %v908_v27, %v907_v25  ;;  %v193_v29 = vpop.f32.mrb[3].mxu0 }
  0xf9   :  { %v285_v30 = vpack.c.bf16 %v193_v29, %v190_v26 }
  0xfb   :  { %937 = vmatprep.mubr.bf16.mxu1 %v285_v30 }
  0xfc   :  { %938 = vmatmul.mubr.bf16.vlgmr.msra.gmra.mrb[0].mxu1 %v286_v28 }
  0xfd   :  { %v911_v32 = vpop.f32.mrb[4].mxu0  ;;  %954 = vmatpush3.bf16.msra.mxu1 %v1088_v24 }
  0xfe   :  { %v206_v33 = vpop.f32.mrb[5].mxu0  ;;  %955 = vmatprep.subr.bf16.mxu1 %v1089_v31 }
  0xff   :  { %v912_v35 = vpop.f32.mrb[6].mxu0 }
 0x100   :  { %v288_v36 = vpack.c.bf16 %v912_v35, %v911_v32  ;;  %v209_v37 = vpop.f32.mrb[7].mxu0 }
 0x101   :  { %v287_v38 = vpack.c.bf16 %v209_v37, %v206_v33  ;;  %956 = vmatpush3.bf16.msra.mxu1 %v1089_v31 }
 0x102   :  { %957 = vmatprep.subr.bf16.mxu1 %v1090_v34 }
 0x103   :  { %941 = vmatprep.mubr.bf16.mxu1 %v287_v38 }
 0x104   :  { %942 = vmatmul.mubr.bf16.gmra.mrb[4].mxu1 %v288_v36 }
 0x105   :  { %v915_v40 = vpop.f32.mrb[8].mxu0  ;;  %958 = vmatpush3.bf16.msra.mxu1 %v1090_v34 }
 0x106   :  { %v222_v41 = vpop.f32.mrb[9].mxu0  ;;  %959 = vmatprep.subr.bf16.mxu1 %v1091_v39 }
 0x107   :  { %v916_v43 = vpop.f32.mrb[10].mxu0 }
 0x108   :  { %v290_v44 = vpack.c.bf16 %v916_v43, %v915_v40  ;;  %v225_v45 = vpop.f32.mrb[11].mxu0 }
 0x109   :  { %v289_v46 = vpack.c.bf16 %v225_v45, %v222_v41  ;;  %960 = vmatpush3.bf16.msra.mxu1 %v1091_v39 }
 0x10a   :  { %961 = vmatprep.subr.bf16.mxu1 %v1092_v42 }
 0x10b   :  { %945 = vmatprep.mubr.bf16.mxu1 %v289_v46 }
 0x10c   :  { %946 = vmatmul.mubr.bf16.gmra.mrb[8].mxu1 %v290_v44 }
 0x10d   :  { %v919_v48 = vpop.f32.mrb[12].mxu0  ;;  %962 = vmatpush3.bf16.msra.mxu1 %v1092_v42 }
 0x10e   :  { %v238_v49 = vpop.f32.mrb[13].mxu0  ;;  %963 = vmatprep.subr.bf16.mxu1 %v1093_v47 }
 0x10f   :  { %v920_v51 = vpop.f32.mrb[14].mxu0 }
 0x110   :  { %v292_v52 = vpack.c.bf16 %v920_v51, %v919_v48  ;;  %v241_v53 = vpop.f32.mrb[15].mxu0 }
 0x111   :  { %v291_v54 = vpack.c.bf16 %v241_v53, %v238_v49  ;;  %964 = vmatpush3.bf16.msra.mxu1 %v1093_v47 }
 0x112   :  { %965 = vmatprep.subr.bf16.mxu1 %v1094_v50 }
 0x113   :  { %949 = vmatprep.mubr.bf16.mxu1 %v291_v54 }
 0x114   :  { %950 = vmatmul.mubr.bf16.gmra.mrb[12].mxu1 %v292_v52 }
 0x115   :  { %966 = vmatpush3.bf16.msra.mxu1 %v1094_v50  ;;  %969 = vmatprep.mubr.bf16.mxu1 %v1096_v55 }
 0x116   :  { %967 = vmatprep.subr.bf16.mxu1 %v1095_v56 }
 0x119   :  { %968 = vmatpush3.bf16.msra.mxu1 %v1095_v56 }
 0x11c   :  { %970 = vmatmul.mubr.bf16.vlgmr.msra.gmra.mrb[0].mxu1 %v1097_v57 }
 0x11d   :  { %973 = vmatprep.mubr.bf16.mxu1 %v1098_v58 }
 0x124   :  { %974 = vmatmul.mubr.bf16.gmra.mrb[4].mxu1 %v1099_v59  ;;  %v686_v59 = vld [vmem:[%s1324_s6] sm:$0xff] }
 0x125   :  { %977 = vmatprep.mubr.bf16.mxu1 %v1100_v60 }
 0x12c   :  { %978 = vmatmul.mubr.bf16.gmra.mrb[8].mxu1 %v1101_v61 }
 0x12d   :  { %981 = vmatprep.mubr.bf16.mxu1 %v1102_v62 }
 0x134   :  { %982 = vmatmul.mubr.bf16.gmra.mrb[12].mxu1 %v1103_v63 }
 0x1ef   :  { %v971_v3 = vpop.f32.mrb[0].mxu1 }
 0x1f0   :  { %v656_v4 = vadd.f32 %v971_v3, %v823_v2  ;;  %v584_v5 = vpop.f32.mrb[1].mxu1 }
 0x1f1   :  { %v654_v6 = vadd.f32 %v823_v2, %v584_v5  ;;  %v972_v7 = vpop.f32.mrb[2].mxu1 }
 0x1f2   :  { %v657_v8 = vadd.f32 %v972_v7, %v823_v2  ;;  %v587_v9 = vpop.f32.mrb[3].mxu1  ;;  %v672_v11 = vmax.f32 %v656_v4, 0.0 }
 0x1f3   :  { %v655_v10 = vadd.f32 %v823_v2, %v587_v9  ;;  %v670_v13 = vmax.f32 %v654_v6, 0.0 }
 0x1f4   :  { %v673_v12 = vmax.f32 %v657_v8, 0.0 }
 0x1f5   :  { %v671_v14 = vmax.f32 %v655_v10, 0.0 }
 0x1f6   :  { %v1024_v15 = vpack.c.bf16 %v673_v12, %v672_v11 }
 0x1f7   :  { %v1021_v16 = vpack.c.bf16 %v671_v14, %v670_v13  ;;  %v975_v17 = vpop.f32.mrb[4].mxu1 }
 0x1f8   :  { %v660_v18 = vadd.f32 %v975_v17, %v823_v2  ;;  %v600_v19 = vpop.f32.mrb[5].mxu1 }
 0x1f9   :  { %v658_v20 = vadd.f32 %v823_v2, %v600_v19  ;;  %v976_v21 = vpop.f32.mrb[6].mxu1  ;;  %1022 = vmatpush3.bf16.msra.mxu0 %v1021_v16 }
 0x1fa   :  { %v661_v22 = vadd.f32 %v976_v21, %v823_v2  ;;  %v603_v23 = vpop.f32.mrb[7].mxu1  ;;  %1023 = vmatprep.subr.bf16.mxu0 %v1128_v0  ;;  %v676_v25 = vmax.f32 %v660_v18, 0.0 }
 0x1fb   :  { %v659_v24 = vadd.f32 %v823_v2, %v603_v23  ;;  %v674_v27 = vmax.f32 %v658_v20, 0.0 }
 0x1fc   :  { %v677_v26 = vmax.f32 %v661_v22, 0.0 }
 0x1fd   :  { %v675_v28 = vmax.f32 %v659_v24, 0.0  ;;  %1025 = vmatpush3.bf16.msra.mxu0 %v1024_v15 }
 0x1fe   :  { %v1030_v29 = vpack.c.bf16 %v677_v26, %v676_v25  ;;  %1026 = vmatprep.subr.bf16.mxu0 %v1128_v0 }
 0x1ff   :  { %v1027_v30 = vpack.c.bf16 %v675_v28, %v674_v27  ;;  %v979_v31 = vpop.f32.mrb[8].mxu1 }
 0x200   :  { %v664_v32 = vadd.f32 %v979_v31, %v823_v2  ;;  %v616_v33 = vpop.f32.mrb[9].mxu1 }
 0x201   :  { %v662_v34 = vadd.f32 %v823_v2, %v616_v33  ;;  %v980_v35 = vpop.f32.mrb[10].mxu1  ;;  %1028 = vmatpush3.bf16.msra.mxu0 %v1027_v30 }
 0x202   :  { %v665_v36 = vadd.f32 %v980_v35, %v823_v2  ;;  %v619_v37 = vpop.f32.mrb[11].mxu1  ;;  %1029 = vmatprep.subr.bf16.mxu0 %v1128_v0  ;;  %v680_v39 = vmax.f32 %v664_v32, 0.0 }
 0x203   :  { %v663_v38 = vadd.f32 %v823_v2, %v619_v37  ;;  %v678_v41 = vmax.f32 %v662_v34, 0.0 }
 0x204   :  { %v681_v40 = vmax.f32 %v665_v36, 0.0 }
 0x205   :  { %v679_v42 = vmax.f32 %v663_v38, 0.0  ;;  %1031 = vmatpush3.bf16.msra.mxu0 %v1030_v29 }
 0x206   :  { %v1036_v43 = vpack.c.bf16 %v681_v40, %v680_v39  ;;  %1032 = vmatprep.subr.bf16.mxu0 %v1128_v0 }
 0x207   :  { %v1033_v44 = vpack.c.bf16 %v679_v42, %v678_v41  ;;  %v983_v45 = vpop.f32.mrb[12].mxu1 }
 0x208   :  { %v668_v46 = vadd.f32 %v983_v45, %v823_v2  ;;  %v632_v47 = vpop.f32.mrb[13].mxu1 }
 0x209   :  { %v666_v48 = vadd.f32 %v823_v2, %v632_v47  ;;  %v984_v49 = vpop.f32.mrb[14].mxu1  ;;  %1034 = vmatpush3.bf16.msra.mxu0 %v1033_v44 }
 0x20a   :  { %v669_v50 = vadd.f32 %v984_v49, %v823_v2  ;;  %v635_v51 = vpop.f32.mrb[15].mxu1  ;;  %1035 = vmatprep.subr.bf16.mxu0 %v1128_v0  ;;  %v684_v53 = vmax.f32 %v668_v46, 0.0 }
 0x20b   :  { %v667_v52 = vadd.f32 %v823_v2, %v635_v51  ;;  %v682_v55 = vmax.f32 %v666_v48, 0.0 }
 0x20c   :  { %v685_v54 = vmax.f32 %v669_v50, 0.0 }
 0x20d   :  { %v683_v56 = vmax.f32 %v667_v52, 0.0  ;;  %1037 = vmatpush3.bf16.msra.mxu0 %v1036_v43 }
 0x20e   :  { %v1042_v57 = vpack.c.bf16 %v685_v54, %v684_v53  ;;  %1038 = vmatprep.subr.bf16.mxu0 %v1128_v0 }
 0x20f   :  { %v1039_v58 = vpack.c.bf16 %v683_v56, %v682_v55 }
 0x211   :  { %1040 = vmatpush3.bf16.msra.mxu0 %v1039_v58 }
 0x212   :  { %1041 = vmatprep.subr.bf16.mxu0 %v1128_v0 }
 0x215   :  { %1043 = vmatpush3.bf16.msra.mxu0 %v1042_v57 }
 0x218   :  { %1018 = vmatmul.mubr.f32.vlgmr.msra.gmra.mrb[16].mxu0 %v686_v59 }
 0x2eb   :  { %v753_v60 = vpop.f32.mrb[16].mxu0 }
 0x2ec   :  { %761 = vst [vmem:[#allocation2] sm:$0xff] %v753_v60  ;;  %v1019_v61 = vpop.f32.mrb[17].mxu0 }
 0x2ed   :  { %1115 = shalt.err (!%p1112_p4)
}
 0x2ee   :  { %s1116_s11 = scalar_lea.hbm %s1325_s7, 128 }
 0x2ef   :  { %p1117_p5 = scmp.ne.s32.totalorder %s1325_s7, %s1116_s11  ;;  %p1120_p6 = scmp.lt.u32.totalorder %s1116_s11, %s1325_s7 }
 0x2f1   :  { %p1122_p7 = pnand %p1120_p6, %p1117_p5 }
 0x2f3   :  { %1125 = shalt.err (!%p1122_p7)
}
 0x2f4   :  { %778 = dma.vmem_to_hbm [thread:$0]  %s776_s2, 128, %s1325_s7, [#allocation3]  }
 0x2f5   :  { %1126 = dma.done.wait [#allocation3], 128  }
 0x2f6   :  { %1127 = vsyncadd [#allocation3], 4294967168 }
 0x2f7   :  { %782 = vsyncpa [#allocation3], 1 }

</bundles_post_ra>
